<compile_context>
chip_gen: v5e
topology: v5e:2x2
jax: 0.10.0
libtpu: 0.0.40
codegen_flags: <defaults>
</compile_context>

<pallas_src>
import jax
import jax.numpy as jnp
from jax.experimental import pallas as pl
from jax.experimental.pallas import tpu as pltpu


def _round_up(x, m):
    return ((x + m - 1) // m) * m


def dense_ae_kernel(x_ref, w1_ref, b1_ref, w2_ref, b2_ref, out_ref):
    """x: (TM, D_in) f32, w1: (D_in, D_lat_p) bf16, b1: (1, D_lat_p) f32,
       w2: (D_lat_p, TN) bf16, b2: (1, TN) f32, out: (TM, TN) f32."""
    # Cast to bf16 in-kernel (cheap VPU op hidden under DMA; avoids a separate
    # XLA cast pass over x in HBM).
    x = x_ref[...].astype(jnp.bfloat16)

    # encoder: Linear (bf16 MXU, f32 accumulate) + bias + ReLU in f32
    z = jnp.dot(x, w1_ref[...], preferred_element_type=jnp.float32) + b1_ref[...]
    z = jnp.maximum(z, 0.0)

    # decoder: Linear (bf16 MXU, f32 accumulate) + bias
    y = jnp.dot(z.astype(w2_ref.dtype), w2_ref[...],
                preferred_element_type=jnp.float32) + b2_ref[...]

    # Exact sigmoid with a single EUP transcendental: sigmoid(y) = 0.5 + 0.5*tanh(y/2).
    out_ref[...] = (0.5 + 0.5 * jnp.tanh(0.5 * y)).astype(out_ref.dtype)


def prepare_params(w1, b1, w2, b2):
    """One-time padding/casting of weights (do NOT call per forward pass).

    w1: (D_in, D_lat), b1: (D_lat,), w2: (D_lat, D_in), b2: (D_in,).
    Latent dim is zero-padded to a multiple of 128 so both matmuls are
    lane-dense on the MXU. Padded units see ReLU(0 + 0) = 0 and feed zero rows
    of w2, so the forward is numerically identical.
    """
    D_in, D_lat = w1.shape
    assert w2.shape == (D_lat, D_in)
    D_lat_p = max(128, _round_up(D_lat, 128))

    w1p = jnp.zeros((D_in, D_lat_p), jnp.bfloat16).at[:, :D_lat].set(
        w1.astype(jnp.bfloat16))
    b1p = jnp.zeros((1, D_lat_p), jnp.float32).at[:, :D_lat].set(
        b1.reshape(1, D_lat).astype(jnp.float32))
    w2p = jnp.zeros((D_lat_p, D_in), jnp.bfloat16).at[:D_lat, :].set(
        w2.astype(jnp.bfloat16))
    b2p = b2.reshape(1, D_in).astype(jnp.float32)
    return w1p, b1p, w2p, b2p


def dense_autoencoder(x_nchw, params):
    """x_nchw: (B, C, H, W) float32; params from prepare_params().
    Returns the f32 reconstruction with the same (B, C, H, W) shape."""
    w1p, b1p, w2p, b2p = params
    B, C, H, W = x_nchw.shape
    D_in = C * H * W
    D_lat_p = w1p.shape[1]
    assert w1p.shape == (D_in, D_lat_p)
    assert w2p.shape == (D_lat_p, D_in)

    # nn.Flatten() semantics; stays f32 (cast to bf16 happens inside the kernel).
    x2d = x_nchw.reshape(B, D_in)

    # ---- Batch tile: round up to a sublane multiple, cap from VMEM budget;
    # ragged last tile is handled by Pallas boundary masking (each output row
    # depends only on its own input row).
    TM = min(_round_up(B, 8), 512)
    if TM >= B:
        TM = B          # full-dim block is always legal (tiny / odd batches)
    grid_m = pl.cdiv(B, TM)

    # ---- Output-column tile: when the batch grid has only one tile, split the
    # decoder output columns so both v7x TensorCores get work. The encoder is
    # recomputed per column tile, which is negligible at small B.
    if grid_m >= 2 or D_in % 256 != 0:
        TN = D_in
    else:
        TN = D_in // 2
    grid_n = pl.cdiv(D_in, TN)

    grid = (grid_m, grid_n)

    # Resident (constant-index) inputs get single buffering; w2/b2 only when
    # they are actually constant across the grid (grid_n == 1).
    resident = pl.Buffered(1)
    w2_mode = resident if grid_n == 1 else None
    w2_bufs = 1 if grid_n == 1 else 2

    # ---- Scoped-VMEM budget (with headroom), clamped to the v7x physical
    # per-TensorCore VMEM so the same config is safe on every generation.
    vmem_need = (
        2 * TM * D_in * 4            # x tile, f32, double-buffered
        + 2 * TM * TN * 4            # out tile, f32, double-buffered
        + D_in * D_lat_p * 2         # w1 bf16, single-buffered
        + D_lat_p * 4                # b1 f32, single-buffered
        + w2_bufs * D_lat_p * TN * 2  # w2 bf16
        + w2_bufs * TN * 4            # b2 f32
        + TM * D_in * 2              # bf16 cast of x (intermediate)
        + TM * D_lat_p * (4 + 2)     # z f32 + bf16 (intermediates)
        + TM * TN * 4                # y f32 (intermediate)
    )
    vmem_limit = min(max(int(vmem_need * 1.5) + (2 << 20), 16 << 20), 64 << 20)

    cost = pl.CostEstimate(
        flops=2 * 2 * B * D_in * D_lat_p,      # two matmuls
        transcendentals=B * D_in,              # tanh in sigmoid
        bytes_accessed=(x2d.size * 4 + w1p.size * 2 + w2p.size * 2
                        + b1p.size * 4 + b2p.size * 4 + B * D_in * 4),
    )

    recon2d = pl.pallas_call(
        dense_ae_kernel,
        out_shape=jax.ShapeDtypeStruct((B, D_in), jnp.float32),
        grid=grid,
        in_specs=[
            # activations: tiled over the batch grid axis (pipelined DMA)
            pl.BlockSpec((TM, D_in), lambda i, j: (i, 0)),
            # weights / biases: constant index_map -> resident in VMEM
            pl.BlockSpec((D_in, D_lat_p), lambda i, j: (0, 0),
                         pipeline_mode=resident),
            pl.BlockSpec((1, D_lat_p), lambda i, j: (0, 0),
                         pipeline_mode=resident),
            pl.BlockSpec((D_lat_p, TN), lambda i, j: (0, j),
                         pipeline_mode=w2_mode),
            pl.BlockSpec((1, TN), lambda i, j: (0, j),
                         pipeline_mode=w2_mode),
        ],
        # Output last dim is a multiple of 128 (or the full D_in) -> lane-dense stores.
        out_specs=pl.BlockSpec((TM, TN), lambda i, j: (i, j)),
        compiler_params=pltpu.CompilerParams(
            dimension_semantics=("parallel", "parallel"),  # shard grid across TCs (v7x)
            vmem_limit_bytes=vmem_limit,
        ),
        cost_estimate=cost,
    )(x2d, w1p, b1p, w2p, b2p)

    return recon2d.reshape(B, C, H, W)


def init_params(key, input_dim, latent_dim):
    """nn.Linear default init: U(-1/sqrt(fan_in), 1/sqrt(fan_in)).
    Weights stored as (in_features, out_features) (W^T of the torch layout)."""
    k1, k2, k3, k4 = jax.random.split(key, 4)
    lim1 = 1.0 / jnp.sqrt(input_dim)
    lim2 = 1.0 / jnp.sqrt(latent_dim)
    w1 = jax.random.uniform(k1, (input_dim, latent_dim), jnp.float32, -lim1, lim1)
    b1 = jax.random.uniform(k2, (latent_dim,), jnp.float32, -lim1, lim1)
    w2 = jax.random.uniform(k3, (latent_dim, input_dim), jnp.float32, -lim2, lim2)
    b2 = jax.random.uniform(k4, (input_dim,), jnp.float32, -lim2, lim2)
    return w1, b1, w2, b2


if __name__ == "__main__":
    key = jax.random.PRNGKey(0)
    kx, kp = jax.random.split(key)

    # Small shapes consistent with the module: batch=2, channels=4, spatial=16.
    B, C, H, W = 2, 4, 16, 16
    input_dim = C * H * W       # 1024
    latent_dim = 32

    x = jax.random.normal(kx, (B, C, H, W), dtype=jnp.float32)
    w1, b1, w2, b2 = init_params(kp, input_dim, latent_dim)

    # One-time weight preparation (padding + bf16 cast), then the forward pass.
    params = prepare_params(w1, b1, w2, b2)
    out = dense_autoencoder(x, params)
    out = jax.block_until_ready(out)

    # Pure-JAX f32 reference of the same forward semantics.
    x2d = x.reshape(B, input_dim)
    z_ref = jnp.maximum(x2d @ w1 + b1, 0.0)
    ref = jax.nn.sigmoid(z_ref @ w2 + b2).reshape(B, C, H, W)

    assert out.shape == (B, C, H, W)
    # bf16 weights/activations -> loose but tight-enough tolerance.
    max_err = float(jnp.max(jnp.abs(out - ref)))
    assert max_err < 2e-2, f"max abs err {max_err}"

    print("KERNEL_OK")
</pallas_src>

<mosaic_0001>
module attributes {stable_mosaic.version = 11 : i64} {
  func.func @dense_ae_kernel(%arg0: i32, %arg1: i32, %arg2: memref<2x1024xf32, #tpu.memory_space<vmem>>, %arg3: memref<1024x128xbf16, #tpu.memory_space<vmem>>, %arg4: memref<1x128xf32, #tpu.memory_space<vmem>>, %arg5: memref<128x512xbf16, #tpu.memory_space<vmem>>, %arg6: memref<1x512xf32, #tpu.memory_space<vmem>>, %arg7: memref<2x512xf32, #tpu.memory_space<vmem>>) attributes {dimension_semantics = [#tpu.dimension_semantics<parallel>, #tpu.dimension_semantics<parallel>], iteration_bounds = array<i64: 1, 2>, scalar_prefetch = 0 : i64, scratch_operands = 0 : i64, tpu.core_type = #tpu.core_type<tc>, window_params = [{transform_indices = @transform_0, window_bounds = array<i64: 2, 1024>}, {pipeline_mode = #tpu.pipeline_mode<synchronous>, transform_indices = @transform_1, window_bounds = array<i64: 1024, 128>}, {pipeline_mode = #tpu.pipeline_mode<synchronous>, transform_indices = @transform_2, window_bounds = array<i64: 1, 128>}, {transform_indices = @transform_3, window_bounds = array<i64: 128, 512>}, {transform_indices = @transform_4, window_bounds = array<i64: 1, 512>}, {transform_indices = @transform_5, window_bounds = array<i64: 2, 512>}]} {
    %c0 = arith.constant 0 : index
    %c0_0 = arith.constant 0 : index
    %0 = vector.load %arg2[%c0, %c0_0] : memref<2x1024xf32, #tpu.memory_space<vmem>>, vector<2x1024xf32>
    %1 = arith.truncf %0 : vector<2x1024xf32> to vector<2x1024xbf16>
    %c0_1 = arith.constant 0 : index
    %c0_2 = arith.constant 0 : index
    %2 = vector.load %arg3[%c0_1, %c0_2] : memref<1024x128xbf16, #tpu.memory_space<vmem>>, vector<1024x128xbf16>
    %cst = arith.constant dense<0.000000e+00> : vector<2x128xf32>
    %3 = tpu.matmul %1, %2, %cst {dimension_numbers = #tpu.dot_dimension_numbers<[1], [0], [0], [1], [0, 0, 1, 1], [], []>} : vector<2x1024xbf16>, vector<1024x128xbf16>, vector<2x128xf32> -> vector<2x128xf32>
    %c0_3 = arith.constant 0 : index
    %c0_4 = arith.constant 0 : index
    %4 = vector.load %arg4[%c0_3, %c0_4] : memref<1x128xf32, #tpu.memory_space<vmem>>, vector<1x128xf32>
    %5 = vector.broadcast %4 : vector<1x128xf32> to vector<2x128xf32>
    %6 = arith.addf %3, %5 : vector<2x128xf32>
    %cst_5 = arith.constant 0.000000e+00 : f32
    %7 = vector.broadcast %cst_5 : f32 to vector<2x128xf32>
    %8 = arith.maximumf %6, %7 : vector<2x128xf32>
    %9 = arith.truncf %8 : vector<2x128xf32> to vector<2x128xbf16>
    %c0_6 = arith.constant 0 : index
    %c0_7 = arith.constant 0 : index
    %10 = vector.load %arg5[%c0_6, %c0_7] : memref<128x512xbf16, #tpu.memory_space<vmem>>, vector<128x512xbf16>
    %cst_8 = arith.constant dense<0.000000e+00> : vector<2x512xf32>
    %11 = tpu.matmul %9, %10, %cst_8 {dimension_numbers = #tpu.dot_dimension_numbers<[1], [0], [0], [1], [0, 0, 1, 1], [], []>} : vector<2x128xbf16>, vector<128x512xbf16>, vector<2x512xf32> -> vector<2x512xf32>
    %c0_9 = arith.constant 0 : index
    %c0_10 = arith.constant 0 : index
    %12 = vector.load %arg6[%c0_9, %c0_10] : memref<1x512xf32, #tpu.memory_space<vmem>>, vector<1x512xf32>
    %13 = vector.broadcast %12 : vector<1x512xf32> to vector<2x512xf32>
    %14 = arith.addf %11, %13 : vector<2x512xf32>
    %cst_11 = arith.constant 5.000000e-01 : f32
    %15 = vector.broadcast %cst_11 : f32 to vector<2x512xf32>
    %16 = arith.mulf %15, %14 : vector<2x512xf32>
    %17 = math.tanh %16 : vector<2x512xf32>
    %cst_12 = arith.constant 5.000000e-01 : f32
    %18 = vector.broadcast %cst_12 : f32 to vector<2x512xf32>
    %19 = arith.mulf %18, %17 : vector<2x512xf32>
    %cst_13 = arith.constant 5.000000e-01 : f32
    %20 = vector.broadcast %cst_13 : f32 to vector<2x512xf32>
    %21 = arith.addf %20, %19 : vector<2x512xf32>
    %c0_14 = arith.constant 0 : index
    %c0_15 = arith.constant 0 : index
    %22 = vector.load %arg7[%c0_14, %c0_15] : memref<2x512xf32, #tpu.memory_space<vmem>>, vector<2x512xf32>
    tpu.vector_store %arg7[%c0_14, %c0_15], %21 {strides = array<i32>} : memref<2x512xf32, #tpu.memory_space<vmem>>, vector<2x512xf32>,
    return
  }
  func.func @transform_0(%arg0: i32, %arg1: i32) -> (i32, i32) {
    %c0_i32 = arith.constant 0 : i32
    %c0_i32_0 = arith.constant 0 : i32
    return %arg0, %c0_i32 : i32, i32
  }
  func.func @transform_1(%arg0: i32, %arg1: i32) -> (i32, i32) {
    %c0_i32 = arith.constant 0 : i32
    %c0_i32_0 = arith.constant 0 : i32
    %c0_i32_1 = arith.constant 0 : i32
    return %c0_i32, %c0_i32_0 : i32, i32
  }
  func.func @transform_2(%arg0: i32, %arg1: i32) -> (i32, i32) {
    %c0_i32 = arith.constant 0 : i32
    %c0_i32_0 = arith.constant 0 : i32
    %c0_i32_1 = arith.constant 0 : i32
    return %c0_i32, %c0_i32_0 : i32, i32
  }
  func.func @transform_3(%arg0: i32, %arg1: i32) -> (i32, i32) {
    %c0_i32 = arith.constant 0 : i32
    %c0_i32_0 = arith.constant 0 : i32
    return %c0_i32, %arg1 : i32, i32
  }
  func.func @transform_4(%arg0: i32, %arg1: i32) -> (i32, i32) {
    %c0_i32 = arith.constant 0 : i32
    %c0_i32_0 = arith.constant 0 : i32
    return %c0_i32, %arg1 : i32, i32
  }
  func.func @transform_5(%arg0: i32, %arg1: i32) -> (i32, i32) {
    %c0_i32 = arith.constant 0 : i32
    return %arg0, %arg1 : i32, i32
  }
}

</mosaic_0001>

<bundles_post_ra>
// kernel: tpu_custom_call.1
= control target key start
LH: loop header
LB: loop body
LE: loop exit
PB: predicated region body
PF: predicated region fallthrough
CT: control target
= control target key end

     0   :  { %s2511_s0 = inlined_call_operand.hbm [shape: f32[2,1024], index: 0, kind: input, shape index: {}]   ;;  %s2512_s1 = inlined_call_operand.hbm [shape: bf16[1024,128], index: 1, kind: input, shape index: {}]   ;;  %s2513_s2 = inlined_call_operand.vmem [shape: f32[1,128], index: 2, kind: input, shape index: {}]   ;;  %s2514_s3 = inlined_call_operand.hbm [shape: bf16[128,1024], index: 3, kind: input, shape index: {}]   ;;  %s2515_s4 = inlined_call_operand.hbm [shape: f32[1,1024], index: 4, kind: input, shape index: {}]   ;;  %s2516_s5 = inlined_call_operand.hbm [shape: f32[2,1024], index: 5, kind: output, shape index: {}]  }
   0x1   :  { %2525 = sst [smem:[#allocation21_spill]] %s2511_s0 }
   0x2   :  { %2526 = sst [smem:[#allocation22_spill]] %s2512_s1 }
   0x3   :  { %2527 = sst [smem:[#allocation23_spill]] %s2514_s3 }
   0x4   :  { %10 = vsyncpa [#allocation3], 0 }
   0x5   :  { %11 = vsyncpa [#allocation6], 0 }
   0x6   :  { %12 = vsyncpa [#allocation4], 0 }
   0x7   :  { %14 = vsyncpa [#allocation4 + $0x1], 0  ;;  %s2269_s18 = smov 0   ;;  %s2271_s19 = smov 0  }
   0x8   :  { %s2273_s20 = smov 0   ;;  %s2275_s21 = smov 0  }
   0x9   :  { %s2277_s22 = smov 0   ;;  %s2279_s23 = smov 0  }
   0xa LB: > { %2528 = sst [smem:[#allocation14_spill]] %s2210_s18  ;;  %s2300_s24 = sadd.s32 4294967295, %s2230_s23   ;;  %s2230_s23 = sphi %s2279_s23, %s20_s23   ;;  %s2226_s22 = sphi %s2277_s22, %s2555_s22   ;;  %s2222_s21 = sphi %s2275_s21, %s2554_s21   ;;  %s2218_s20 = sphi %s2273_s20, %s2550_s20   ;;  %s2214_s19 = sphi %s2271_s19, %s2553_s19   ;;  %s2210_s18 = sphi %s2269_s18, %s2552_s18  }
   0xb   : > { %2529 = sst [smem:[#allocation15_spill]] %s2218_s20  ;;  %s1415_s25 = sadd.s32 4294967294, %s2230_s23  }
   0xc   : > { %2530 = sst [smem:[#allocation16_spill]] %s2230_s23  ;;  %s29_s26 = sadd.s32 1, %s2226_s22 }
   0xd   : > { %s107_s27 = sadd.s32 1, %s2218_s20  ;;  %p30_p0 = scmp.ge.s32.totalorder %s29_s26, 2 }
   0xe   : > { %p114_p1 = scmp.ne.s32.totalorder %s2218_s20, %s2214_s19  ;;  %p115_p2 = scmp.eq.s32.totalorder %s2230_s23, 0 }
   0xf   : > { %p120_p3 = scmp.ne.s32.totalorder %s2214_s19, %s2210_s18  ;;  %s2557_s26 = smov (%p30_p0, %s29_s26), 0 }
  0x10   : > { %2531 = sst [smem:[#allocation17_spill]] %s2557_s26  ;;  %p2312_p4 = por %p115_p2, %p114_p1 }
  0x11   : > { %p121_p5 = scmp.eq.s32.totalorder %s2300_s24, 0  ;;  %s104_s29 = ssub.s32 %s2226_s22, %s2557_s26 }
  0x12   : > { %p172_p6 = scmp.eq.s32.totalorder %s2300_s24, 1  ;;  %p105_p7 = scmp.eq.s32.totalorder %s104_s29, 0 }
  0x13   : > { %p2322_p8 = por %p121_p5, %p120_p3  ;;  %p178_p10 = scmp.eq.s32.totalorder %s1415_s25, 1 }
  0x14   : > { %p2326_p9 = por %p172_p6, %p114_p1  ;;  %p1416_p12 = scmp.ge.s32.totalorder %s2230_s23, 1 }
  0x15   : > { %s2331_s7 = scalar_select %p105_p7, %s2218_s20, %s107_s27  }
  0x16   : > { %s2534_s6 = scalar_select %p2326_p9, 1, 0 }
  0x17   : > { %2536 = sst [smem:[#allocation19_spill]] %s2331_s7  ;;  %p2333_p11 = por %p178_p10, %p120_p3 }
  0x18   : > { %2535 = sst [smem:[#allocation18_spill]] %s2534_s6  ;;  %p185_p13 = scmp.lt.s32.totalorder %s2230_s23, 3 }
  0x19   : > { %s2537_s8 = scalar_select %p2333_p11, 1, 0 }
  0x1a   : > { %s2539_s0 = sld [smem:[#allocation21_spill]]  ;;  %p2342_p0 = pnand %p1416_p12, %p185_p13 }
  0x1b   : > { %2538 = sst [smem:[#allocation20_spill]] %s2537_s8  ;;  %s2232_s13 = smov [#allocation2]  }
  0x1c   : > { %s202_s14 = sshll.u32 %s2232_s13, 4  ;;  %p1419_p1 = scmp.ge.s32.totalorder %s2230_s23, 2  ;;  %s203_s14 = int_to_ptr.vmem [resolvable:$true] %s202_s14 }
  0x1d   : > { %p1932_p2 = pneg %p2342_p0  ;;  %p1952_p3 = scmp.lt.s32.totalorder %s2230_s23, 2 }
  0x1e   : > { %s230_s15 = sand.u32 1, %s2230_s23   ;;  %s232_s25 = sand.u32 1, %s2218_s20  }
  0x1f   : > { %p2353_p6 = pnand %p1932_p2, %p121_p5  ;;  %p2359_p7 = pnand %p1952_p3, %p2312_p4 }
  0x20   : > { %s200_s11 = sshll.u32 %s2539_s0, 4  ;;  %s1420_s27 = sshll.u32 %s232_s25, 8  ;;  %s201_s11 = int_to_ptr.hbm [resolvable:$true] %s200_s11 }
  0x21   : > { %1935 = dma.hbm_to_vmem [thread:$0]  (!%p2353_p6), %s201_s11, 256, %s203_s14, [#allocation3]  }
  0x22   : > { %s1820_s29 = sshll.u32 %s2226_s22, 4  ;;  %s234_s9 = scalar_lea.vmem [#allocation7], %s1420_s27 }
  0x23   : > { %s242_s10 = sshll.u32 %s234_s9, 4  ;;  %s2543_s3 = sld [smem:[#allocation23_spill]]  ;;  %s243_s10 = int_to_ptr.vmem [resolvable:$true] %s242_s10 }
  0x24   : > { %s2544_s1 = sld [smem:[#allocation22_spill]]  ;;  %s231_s20 = scalar_lea.sflag [#allocation3], %s230_s15 }
  0x25   : > { %s2233_s18 = smov 512   ;;  %s2234_s6 = smov 256  }
  0x26   : > { %s2235_s11 = smov 16   ;;  %s2236_s14 = smov [#allocation5]  }
  0x27   : > { %s213_s0 = sshll.u32 %s2236_s14, 4  ;;  %s2237_s27 = smov 64   ;;  %s214_s0 = int_to_ptr.vmem [resolvable:$true] %s213_s0 }
  0x28   : > { %s1424_s9 = sshll.u32 %s2226_s22, 2 }
  0x29   : > { %s239_s26 = scalar_lea.hbm %s2543_s3, %s1820_s29  ;;  %s2238_s29 = smov 4  }
  0x2a   : > { %s240_s28 = sshll.u32 %s239_s26, 4  ;;  %s211_s8 = sshll.u32 %s2544_s1, 4  ;;  %s241_s28 = int_to_ptr.hbm [resolvable:$true] %s240_s28  ;;  %s212_s8 = int_to_ptr.hbm [resolvable:$true] %s211_s8 }
  0x2b   : > { %1942 = dma.hbm_to_vmem [thread:$0]  (!%p2359_p7), %s241_s28, 4096, %s243_s10, %s231_s20, %s2233_s18, %s2234_s6, %s2235_s11  }
  0x2c   : > { %1938 = dma.hbm_to_vmem [thread:$0]  (!%p2353_p6), %s212_s8, 8192, %s214_s0, [#allocation6], %s2237_s27, %s2237_s27, %s2238_s29  }
  0x2d   : > { %s1423_s26 = sshll.u32 %s232_s25, 2  ;;  %s260_s7 = scalar_lea.hbm %s2515_s4, %s1424_s9 }
  0x2e   : > { %s262_s15 = sshll.u32 %s260_s7, 4  ;;  %s256_s1 = scalar_lea.vmem [#allocation8], %s1423_s26  ;;  %s263_s15 = int_to_ptr.hbm [resolvable:$true] %s262_s15 }
  0x2f   : > { %s264_s3 = sshll.u32 %s256_s1, 4  ;;  %273 = sbr.rel (%p2342_p0) target bundleno = 421 (0x1a5), region = 40  ;;  %s265_s3 = int_to_ptr.vmem [resolvable:$true] %s264_s3 }
  0x30   : > { %1945 = dma.hbm_to_vmem [thread:$0]  (!%p2359_p7), %s263_s15, 64, %s265_s3, %s231_s20  }
  0x34   : > { %2193 = dma.done.wait (%p121_p5), [#allocation3], 256  }
  0x35   : > { %2195 = vsyncadd (%p121_p5), [#allocation3], 4294967040 }
  0x36   : > { %2197 = dma.done.wait (%p121_p5), [#allocation6], 8192  }
  0x37   : > { %2199 = vsyncadd (%p121_p5), [#allocation6], 4294959104  ;;  %s285_s1 = sand.u32 1, %s2300_s24   ;;  %s2395_s3 = sand.u32 1, %s2214_s19  }
  0x38   : > { %s1428_s18 = sshll.u32 %s2395_s3, 8  ;;  %s286_s20 = scalar_lea.sflag [#allocation3], %s285_s1 }
  0x39   : > { %s2398_s6 = scalar_lea.vmem [#allocation7], %s1428_s18 }
  0x3a   : > { %2201 = dma.done.wait (%p2322_p8), %s286_s20, 4160  }
  0x3b   : > { %2203 = vsyncadd (%p2322_p8), %s286_s20, 4294963136  ;;  %v1828_v0 = vld [vmem:[#allocation5 + $0x38] sm:$0xff]  ;;  %v1827_v4 = vld [vmem:[#allocation5 + $0x30] sm:$0xff]  ;;  %s1429_s8 = sshll.u32 %s2395_s3, 2  ;;  %s1430_s16 = sshll.u32 %s2395_s3, 3  ;;  %vm1265_vm0 = vcmask 1041408  }
  0x3c   : > { %v1836_v1 = vld [vmem:[#allocation5 + $0x78] sm:$0xff]  ;;  %882 = vmatpush.bf16.msra.mxu0 %v1828_v0  ;;  %v1835_v5 = vld [vmem:[#allocation5 + $0x70] sm:$0xff]  ;;  %v1826_v8 = vld [vmem:[#allocation5 + $0x28] sm:$0xff]  ;;  %s299_s12 = scalar_lea.vmem [#allocation8], %s1429_s8  ;;  %s1917_s17 = sshll.u32 %s2222_s21, 3  ;;  %vm1267_vm1 = vcmask 1045508  }
  0x3d   : > { %v1844_v2 = vld [vmem:[#allocation5 + $0xb8] sm:$0xff]  ;;  %895 = vmatpush.bf16.msra.mxu1 %v1836_v1  ;;  %v1843_v6 = vld [vmem:[#allocation5 + $0xb0] sm:$0xff]  ;;  %v1834_v9 = vld [vmem:[#allocation5 + $0x68] sm:$0xff]  ;;  %s1287_s28 = scalar_lea.hbm %s2516_s5, %s1917_s17  ;;  %s331_s11 = scalar_lea.vmem [#allocation9], %s1430_s16  ;;  %vm1269_vm2 = vcmask 1043456  }
  0x3e   : > { %v1852_v3 = vld [vmem:[#allocation5 + $0xf8] sm:$0xff]  ;;  %908 = vmatpush.bf16.msra.mxu2 %v1844_v2  ;;  %v1851_v7 = vld [vmem:[#allocation5 + $0xf0] sm:$0xff]  ;;  %v1842_v10 = vld [vmem:[#allocation5 + $0xa8] sm:$0xff]  ;;  %s1289_s14 = sshll.u32 %s331_s11, 4  ;;  %s1291_s0 = sshll.u32 %s1287_s28, 4  ;;  %s1290_s14 = int_to_ptr.vmem [resolvable:$true] %s1289_s14  ;;  %s1292_s0 = int_to_ptr.hbm [resolvable:$true] %s1291_s0 }
  0x3f   : > { %921 = vmatpush.bf16.msra.mxu3 %v1852_v3  ;;  %v1850_v11 = vld [vmem:[#allocation5 + $0xe8] sm:$0xff]  ;;  %v1825_v12 = vld [vmem:[#allocation5 + $0x20] sm:$0xff]  ;;  %v335_v16 = vld [vmem:[#allocation2] sm:$0xff]  ;;  %s1274_s27 = scalar_lea.sflag [#allocation4], %s2395_s3  ;;  %s2154_s29 = sshra.s32 %s1292_s0, 4  ;;  %s2155_s29 = int_to_ptr.hbm [resolvable:$true] %s2154_s29 }
  0x40   : > { %883 = vmatpush.bf16.msra.mxu0 %v1827_v4  ;;  %v1833_v13 = vld [vmem:[#allocation5 + $0x60] sm:$0xff]  ;;  %v1824_v17 = vld [vmem:[#allocation5 + $0x18] sm:$0xff]  ;;  %339 = vst [vmem:[#allocation1] ss:$4 sm:$0xff] %v335_v16  ;;  %v1823_v21 = vld [vmem:[#allocation5 + $0x10] sm:$0xff]  ;;  %s2156_s26 = scalar_lea.hbm %s2155_s29, 8  ;;  %p2161_p10 = scmp.lt.s32.totalorder %s2155_s29, %s2516_s5 }
  0x41   : > { %896 = vmatpush.bf16.msra.mxu1 %v1835_v5  ;;  %v1841_v14 = vld [vmem:[#allocation5 + $0xa0] sm:$0xff]  ;;  %v1832_v18 = vld [vmem:[#allocation5 + $0x58] sm:$0xff]  ;;  %v1831_v22 = vld [vmem:[#allocation5 + $0x50] sm:$0xff]  ;;  %p2157_p4 = scmp.ne.s32.totalorder %s2155_s29, %s2156_s26  ;;  %s2160_s23 = scalar_lea.hbm %s2516_s5, 16 }
  0x42   : > { %909 = vmatpush.bf16.msra.mxu2 %v1843_v6  ;;  %v1849_v15 = vld [vmem:[#allocation5 + $0xe0] sm:$0xff]  ;;  %v1840_v19 = vld [vmem:[#allocation5 + $0x98] sm:$0xff]  ;;  %v1839_v23 = vld [vmem:[#allocation5 + $0x90] sm:$0xff]  ;;  %p2162_p12 = scmp.lt.s32.totalorder %s2160_s23, %s2156_s26 }
  0x43   : > { %922 = vmatpush.bf16.msra.mxu3 %v1851_v7  ;;  %v1848_v20 = vld [vmem:[#allocation5 + $0xd8] sm:$0xff]  ;;  %v1847_v24 = vld [vmem:[#allocation5 + $0xd0] sm:$0xff]  ;;  %v1822_v25 = vld [vmem:[#allocation5 + $0x8] sm:$0xff]  ;;  %p2158_p5 = pnand %p2157_p4, %p2326_p9 }
  0x44   : > { %884 = vmatpush.bf16.msra.mxu0 %v1826_v8  ;;  %v1830_v26 = vld [vmem:[#allocation5 + $0x48] sm:$0xff]  ;;  %v336_v29 = vld [vmem:[#allocation2 + $0x8] sm:$0xff]  ;;  %v1821_v30 = vld [vmem:[#allocation5] sm:$0xff]  ;;  %p2163_p13 = por %p2162_p12, %p2161_p10 }
  0x45   : > { %897 = vmatpush.bf16.msra.mxu1 %v1834_v9  ;;  %v1838_v27 = vld [vmem:[#allocation5 + $0x88] sm:$0xff]  ;;  %v1829_v31 = vld [vmem:[#allocation5 + $0x40] sm:$0xff]  ;;  %341 = vst [vmem:[#allocation1 + $0x20] ss:$4 sm:$0xff] %v336_v29  ;;  %v1860_v34 = vld [vmem:[#allocation5 + $0x138] sm:$0xff]  ;;  %p2159_p8 = pneg %p2158_p5 }
  0x46   : > { %910 = vmatpush.bf16.msra.mxu2 %v1842_v10  ;;  %v1846_v28 = vld [vmem:[#allocation5 + $0xc8] sm:$0xff]  ;;  %v1837_v32 = vld [vmem:[#allocation5 + $0x80] sm:$0xff]  ;;  %v1868_v35 = vld [vmem:[#allocation5 + $0x178] sm:$0xff] }
  0x47   : > { %923 = vmatpush.bf16.msra.mxu3 %v1850_v11  ;;  %v1845_v33 = vld [vmem:[#allocation5 + $0xc0] sm:$0xff]  ;;  %v344_v36 = vld.sshfl [vmem:[#allocation1 + $0x10] sm:$0xff pattern:$0x73625140]  ;;  %v1859_v46 = vld [vmem:[#allocation5 + $0x130] sm:$0xff]  ;;  %p2164_p0 = pnand %p2163_p13, %p2159_p8 }
  0x48   : > { %885 = vmatpush.bf16.msra.mxu0 %v1825_v12  ;;  %v342_v37 = vld.sshfl [vmem:[#allocation1] sm:$0xff pattern:$0x73625140]  ;;  %v345_v38 = vld.sshfl [vmem:[#allocation1 + $0x18] sm:$0xff pattern:$0x73625140]  ;;  %v360_v42 = vpack.c.bf16 %v344_v36, %v344_v36 }
  0x49   : > { %898 = vmatpush.bf16.msra.mxu1 %v1833_v13  ;;  %v343_v39 = vld.sshfl [vmem:[#allocation1 + $0x8] sm:$0xff pattern:$0x73625140]  ;;  %v1876_v40 = vld [vmem:[#allocation5 + $0x1b8] sm:$0xff]  ;;  %v358_v43 = vpack.c.bf16 %v342_v37, %v342_v37  ;;  %v361_v44 = vpack.c.bf16 %v345_v38, %v345_v38  ;;  %v1858_v50 = vld [vmem:[#allocation5 + $0x128] sm:$0xff] }
  0x4a   : > { %911 = vmatpush.bf16.msra.mxu2 %v1841_v14  ;;  %v1884_v41 = vld [vmem:[#allocation5 + $0x1f8] sm:$0xff]  ;;  %v359_v45 = vpack.c.bf16 %v343_v39, %v343_v39  ;;  %v1867_v47 = vld [vmem:[#allocation5 + $0x170] sm:$0xff]  ;;  %v1866_v51 = vld [vmem:[#allocation5 + $0x168] sm:$0xff] }
  0x4b   : > { %924 = vmatpush.bf16.msra.mxu3 %v1849_v15  ;;  %v1875_v48 = vld [vmem:[#allocation5 + $0x1b0] sm:$0xff]  ;;  %v1874_v52 = vld [vmem:[#allocation5 + $0x1a8] sm:$0xff]  ;;  %v1857_v54 = vld [vmem:[#allocation5 + $0x120] sm:$0xff] }
  0x4c   : > { %886 = vmatpush.bf16.msra.mxu0 %v1824_v17  ;;  %v1883_v49 = vld [vmem:[#allocation5 + $0x1f0] sm:$0xff]  ;;  %v1882_v53 = vld [vmem:[#allocation5 + $0x1e8] sm:$0xff]  ;;  %v1865_v55 = vld [vmem:[#allocation5 + $0x160] sm:$0xff] }
  0x4d   : > { %899 = vmatpush.bf16.msra.mxu1 %v1832_v18  ;;  %v1873_v56 = vld [vmem:[#allocation5 + $0x1a0] sm:$0xff]  ;;  %v1856_v58 = vld [vmem:[#allocation5 + $0x118] sm:$0xff]  ;;  %v1855_v62 = vld [vmem:[#allocation5 + $0x110] sm:$0xff] }
  0x4e   : > { %912 = vmatpush.bf16.msra.mxu2 %v1840_v19  ;;  %v1881_v57 = vld [vmem:[#allocation5 + $0x1e0] sm:$0xff]  ;;  %v1864_v59 = vld [vmem:[#allocation5 + $0x158] sm:$0xff]  ;;  %v1863_v63 = vld [vmem:[#allocation5 + $0x150] sm:$0xff] }
  0x4f   : > { %925 = vmatpush.bf16.msra.mxu3 %v1848_v20  ;;  %v1872_v60 = vld [vmem:[#allocation5 + $0x198] sm:$0xff]  ;;  %v1871_v0 = vld [vmem:[#allocation5 + $0x190] sm:$0xff]  ;;  %v1854_v2 = vld [vmem:[#allocation5 + $0x108] sm:$0xff] }
  0x50   : > { %887 = vmatpush.bf16.msra.mxu0 %v1823_v21  ;;  %v1880_v61 = vld [vmem:[#allocation5 + $0x1d8] sm:$0xff]  ;;  %v1879_v1 = vld [vmem:[#allocation5 + $0x1d0] sm:$0xff]  ;;  %v1862_v3 = vld [vmem:[#allocation5 + $0x148] sm:$0xff] }
  0x51   : > { %900 = vmatpush.bf16.msra.mxu1 %v1831_v22  ;;  %v1870_v4 = vld [vmem:[#allocation5 + $0x188] sm:$0xff]  ;;  %v1853_v6 = vld [vmem:[#allocation5 + $0x100] sm:$0xff]  ;;  %v347_v11 = vld.sshfl [vmem:[#allocation1 + $0x28] sm:$0xff pattern:$0x73625140] }
  0x52   : > { %913 = vmatpush.bf16.msra.mxu2 %v1839_v23  ;;  %v1878_v5 = vld [vmem:[#allocation5 + $0x1c8] sm:$0xff]  ;;  %v1861_v7 = vld [vmem:[#allocation5 + $0x140] sm:$0xff]  ;;  %v348_v12 = vld.sshfl [vmem:[#allocation1 + $0x30] sm:$0xff pattern:$0x73625140]  ;;  %v363_v15 = vpack.c.bf16 %v347_v11, %v347_v11 }
  0x53   : > { %926 = vmatpush.bf16.msra.mxu3 %v1847_v24  ;;  %v1869_v8 = vld [vmem:[#allocation5 + $0x180] sm:$0xff]  ;;  %v346_v10 = vld.sshfl [vmem:[#allocation1 + $0x20] sm:$0xff pattern:$0x73625140]  ;;  %v364_v16 = vpack.c.bf16 %v348_v12, %v348_v12  ;;  %v1915_v19 = vld [vmem:[%s2398_s6 + $0xec] sm:$0xf0] }
  0x54   : > { %888 = vmatpush.bf16.msra.mxu0 %v1822_v25  ;;  %v1877_v9 = vld [vmem:[#allocation5 + $0x1c0] sm:$0xff]  ;;  %v362_v14 = vpack.c.bf16 %v346_v10, %v346_v10  ;;  %v1803_v22 = vld [vmem:[%s2398_s6 + $0xf0] sm:$0xf0]  ;;  %v1809_v23 = vld [vmem:[%s2398_s6 + $0xe8] sm:$0xf] }
  0x55   : > { %901 = vmatpush.bf16.msra.mxu1 %v1830_v26  ;;  %v349_v13 = vld.sshfl [vmem:[#allocation1 + $0x38] sm:$0xff pattern:$0x73625140]  ;;  %v1916_v24 = vld [vmem:[%s2398_s6 + $0xf4] sm:$0xf0] }
  0x56   : > { %914 = vmatpush.bf16.msra.mxu2 %v1838_v27  ;;  %v365_v17 = vpack.c.bf16 %v349_v13, %v349_v13  ;;  %v1801_v18 = vld [vmem:[%s2398_s6 + $0xe0] sm:$0xf]  ;;  %v1913_v20 = vld [vmem:[%s2398_s6 + $0xe4] sm:$0xf]  ;;  %v1810_v26 = vor.u32 %v1916_v24, %v1809_v23  ;;  %v1914_v27 = vld [vmem:[%s2398_s6 + $0xec] sm:$0xf] }
  0x57   : > { %927 = vmatpush.bf16.msra.mxu3 %v1846_v28  ;;  %v1802_v21 = vor.u32 %v1915_v19, %v1801_v18  ;;  %v1806_v25 = vor.u32 %v1913_v20, %v1803_v22  ;;  %v1811_v28 = vld [vmem:[%s2398_s6 + $0xf8] sm:$0xf0]  ;;  %v1785_v29 = vld [vmem:[%s2398_s6 + $0xc0] sm:$0xf]  ;;  %v1793_v36 = vld [vmem:[%s2398_s6 + $0xc8] sm:$0xf] }
  0x58   : > { %889 = vmatpush.bf16.msra.mxu0 %v1821_v30  ;;  %v1814_v30 = vor.u32 %v1914_v27, %v1811_v28  ;;  %v1912_v37 = vld [vmem:[%s2398_s6 + $0xd4] sm:$0xf0]  ;;  %v1910_v38 = vld [vmem:[%s2398_s6 + $0xcc] sm:$0xf]  ;;  %v1747_v12 = vld [vmem:[%s2398_s6 + $0x78] sm:$0xf0] }
  0x59   : > { %902 = vmatpush.bf16.msra.mxu1 %v1829_v31  ;;  %v1911_v31 = vld [vmem:[%s2398_s6 + $0xcc] sm:$0xf0]  ;;  %v1794_v39 = vor.u32 %v1912_v37, %v1793_v36  ;;  %v1898_v11 = vld [vmem:[%s2398_s6 + $0x6c] sm:$0xf]  ;;  %v1723_v19 = vld [vmem:[%s2398_s6 + $0x50] sm:$0xf0] }
  0x5a   : > { %915 = vmatpush.bf16.msra.mxu2 %v1837_v32  ;;  %v1909_v32 = vld [vmem:[%s2398_s6 + $0xc4] sm:$0xf]  ;;  %v1750_v13 = vor.u32 %v1898_v11, %v1747_v12  ;;  %v1729_v20 = vld [vmem:[%s2398_s6 + $0x48] sm:$0xf]  ;;  %v1705_v28 = vld [vmem:[%s2398_s6 + $0x20] sm:$0xf] }
  0x5b   : > { %928 = vmatpush.bf16.msra.mxu3 %v1845_v33  ;;  %890 = vmatmul.bf16.vlgmr.msra.gmra.mxu0 %v358_v43  ;;  %v1787_v33 = vld [vmem:[%s2398_s6 + $0xd0] sm:$0xf0]  ;;  %v1907_v43 = vld [vmem:[%s2398_s6 + $0xac] sm:$0xf0]  ;;  %v1890_v37 = vld [vmem:[%s2398_s6 + $0x2c] sm:$0xf] }
  0x5c   : > { %934 = vmatpush.bf16.msrb.mxu0 %v1860_v34  ;;  %903 = vmatmul.bf16.vlgmr.msra.gmra.mxu1 %v359_v45  ;;  %v1786_v34 = vor.u32 %v1911_v31, %v1785_v29  ;;  %v1891_v29 = vld [vmem:[%s2398_s6 + $0x2c] sm:$0xf0] }
  0x5d   : > { %947 = vmatpush.bf16.msrb.mxu1 %v1868_v35  ;;  %916 = vmatmul.bf16.vlgmr.msra.gmra.mxu2 %v360_v42  ;;  %v1790_v35 = vor.u32 %v1909_v32, %v1787_v33  ;;  %v1769_v42 = vld [vmem:[%s2398_s6 + $0xa0] sm:$0xf]  ;;  %v1706_v31 = vor.u32 %v1891_v29, %v1705_v28  ;;  %v1707_v32 = vld [vmem:[%s2398_s6 + $0x30] sm:$0xf0]  ;;  %v1713_v33 = vld [vmem:[%s2398_s6 + $0x28] sm:$0xf] }
  0x5e   : > { %960 = vmatpush.bf16.msrb.mxu2 %v1876_v40  ;;  %929 = vmatmul.bf16.vlgmr.msra.gmra.mxu3 %v361_v44  ;;  %v1795_v40 = vld [vmem:[%s2398_s6 + $0xd8] sm:$0xf0]  ;;  %v1905_v44 = vld [vmem:[%s2398_s6 + $0xa4] sm:$0xf]  ;;  %v1770_v45 = vor.u32 %v1907_v43, %v1769_v42  ;;  %v1689_v42 = vld [vmem:[%s2398_s6] sm:$0xf] }
  0x5f   : > { %973 = vmatpush.bf16.msrb.mxu3 %v1884_v41  ;;  %v1798_v41 = vor.u32 %v1910_v38, %v1795_v40  ;;  %v1715_v38 = vld [vmem:[%s2398_s6 + $0x38] sm:$0xf0]  ;;  %v1887_v43 = vld [vmem:[%s2398_s6 + $0xc] sm:$0xf0] }
  0x60   : > { %935 = vmatpush.bf16.msrb.mxu0 %v1859_v46  ;;  %v1771_v46 = vld [vmem:[%s2398_s6 + $0xb0] sm:$0xf0]  ;;  %v1718_v40 = vor.u32 %v1890_v37, %v1715_v38 }
  0x61   : > { %948 = vmatpush.bf16.msrb.mxu1 %v1867_v47  ;;  %v1777_v47 = vld [vmem:[%s2398_s6 + $0xa8] sm:$0xf] }
  0x62   : > { %961 = vmatpush.bf16.msrb.mxu2 %v1875_v48  ;;  %v1908_v48 = vld [vmem:[%s2398_s6 + $0xb4] sm:$0xf0] }
  0x63   : > { %974 = vmatpush.bf16.msrb.mxu3 %v1883_v49  ;;  %v1774_v49 = vor.u32 %v1905_v44, %v1771_v46  ;;  %v1885_v44 = vld [vmem:[%s2398_s6 + $0x4] sm:$0xf]  ;;  %v1690_v46 = vor.u32 %v1887_v43, %v1689_v42 }
  0x64   : > { %936 = vmatpush.bf16.msrb.mxu0 %v1858_v50  ;;  %v1778_v50 = vor.u32 %v1908_v48, %v1777_v47  ;;  %v1691_v47 = vld [vmem:[%s2398_s6 + $0x10] sm:$0xf0]  ;;  %v1697_v48 = vld [vmem:[%s2398_s6 + $0x8] sm:$0xf] }
  0x65   : > { %949 = vmatpush.bf16.msrb.mxu1 %v1866_v51  ;;  %v1906_v51 = vld [vmem:[%s2398_s6 + $0xac] sm:$0xf] }
  0x66   : > { %962 = vmatpush.bf16.msrb.mxu2 %v1874_v52  ;;  %v1779_v52 = vld [vmem:[%s2398_s6 + $0xb8] sm:$0xf0] }
  0x67   : > { %975 = vmatpush.bf16.msrb.mxu3 %v1882_v53  ;;  %v1753_v53 = vld [vmem:[%s2398_s6 + $0x80] sm:$0xf] }
  0x68   : > { %937 = vmatpush.bf16.msrb.mxu0 %v1857_v54  ;;  %v1782_v54 = vor.u32 %v1906_v51, %v1779_v52  ;;  %v1694_v51 = vor.u32 %v1885_v44, %v1691_v47 }
  0x69   : > { %950 = vmatpush.bf16.msrb.mxu1 %v1865_v55  ;;  %v1903_v55 = vld [vmem:[%s2398_s6 + $0x8c] sm:$0xf0] }
  0x6a   : > { %963 = vmatpush.bf16.msrb.mxu2 %v1873_v56  ;;  %v1901_v56 = vld [vmem:[%s2398_s6 + $0x84] sm:$0xf] }
  0x6b   : > { %976 = vmatpush.bf16.msrb.mxu3 %v1881_v57  ;;  %v1755_v57 = vld [vmem:[%s2398_s6 + $0x90] sm:$0xf0] }
  0x6c   : > { %938 = vmatpush.bf16.msrb.mxu0 %v1856_v58  ;;  %v1761_v58 = vld [vmem:[%s2398_s6 + $0x88] sm:$0xf] }
  0x6d   : > { %951 = vmatpush.bf16.msrb.mxu1 %v1864_v59  ;;  %v1904_v59 = vld [vmem:[%s2398_s6 + $0x94] sm:$0xf0] }
  0x6e   : > { %964 = vmatpush.bf16.msrb.mxu2 %v1872_v60  ;;  %v1902_v60 = vld [vmem:[%s2398_s6 + $0x8c] sm:$0xf] }
  0x6f   : > { %977 = vmatpush.bf16.msrb.mxu3 %v1880_v61  ;;  %v1754_v61 = vor.u32 %v1903_v55, %v1753_v53  ;;  %v1886_v53 = vld [vmem:[%s2398_s6 + $0xc] sm:$0xf] }
  0x70   : > { %939 = vmatpush.bf16.msrb.mxu0 %v1855_v62  ;;  %v1763_v62 = vld [vmem:[%s2398_s6 + $0x98] sm:$0xf0] }
  0x71   : > { %952 = vmatpush.bf16.msrb.mxu1 %v1863_v63  ;;  %v1758_v63 = vor.u32 %v1901_v56, %v1755_v57  ;;  %v2011_v56 = vld [vmem:[%s2513_s2] ss:$0 sm:$0xff] }
  0x72   : > { %965 = vmatpush.bf16.msrb.mxu2 %v1871_v0  ;;  %v1762_v0 = vor.u32 %v1904_v59, %v1761_v58 }
  0x73   : > { %978 = vmatpush.bf16.msrb.mxu3 %v1879_v1  ;;  %v1766_v1 = vor.u32 %v1902_v60, %v1763_v62 }
  0x74   : > { %940 = vmatpush.bf16.msrb.mxu0 %v1854_v2  ;;  %v1737_v2 = vld [vmem:[%s2398_s6 + $0x60] sm:$0xf] }
  0x75   : > { %953 = vmatpush.bf16.msrb.mxu1 %v1862_v3  ;;  %v1899_v3 = vld [vmem:[%s2398_s6 + $0x6c] sm:$0xf0] }
  0x76   : > { %966 = vmatpush.bf16.msrb.mxu2 %v1870_v4  ;;  %v1897_v4 = vld [vmem:[%s2398_s6 + $0x64] sm:$0xf] }
  0x77   : > { %979 = vmatpush.bf16.msrb.mxu3 %v1878_v5  ;;  %v1738_v5 = vor.u32 %v1899_v3, %v1737_v2 }
  0x78   : > { %941 = vmatpush.bf16.msrb.mxu0 %v1853_v6  ;;  %v1739_v6 = vld [vmem:[%s2398_s6 + $0x70] sm:$0xf0] }
  0x79   : > { %954 = vmatpush.bf16.msrb.mxu1 %v1861_v7  ;;  %v1745_v7 = vld [vmem:[%s2398_s6 + $0x68] sm:$0xf] }
  0x7a   : > { %967 = vmatpush.bf16.msrb.mxu2 %v1869_v8  ;;  %v1900_v8 = vld [vmem:[%s2398_s6 + $0x74] sm:$0xf0] }
  0x7b   : > { %980 = vmatpush.bf16.msrb.mxu3 %v1877_v9  ;;  %942 = vmatmul.bf16.vlgmr.msrb.gmra.mxu0 %v362_v14  ;;  %v1742_v9 = vor.u32 %v1897_v4, %v1739_v6  ;;  %v1746_v10 = vor.u32 %v1900_v8, %v1745_v7  ;;  %v1721_v14 = vld [vmem:[%s2398_s6 + $0x40] sm:$0xf] }
  0x7c   : > { %955 = vmatmul.bf16.vlgmr.msrb.gmra.mxu1 %v363_v15  ;;  %1190 = vmatpush.bf16.msra.mxu0 %v1802_v21  ;;  %v1895_v15 = vld [vmem:[%s2398_s6 + $0x4c] sm:$0xf0]  ;;  %v1896_v21 = vld [vmem:[%s2398_s6 + $0x54] sm:$0xf0] }
  0x7d   : > { %968 = vmatmul.bf16.vlgmr.msrb.gmra.mxu2 %v364_v16  ;;  %1203 = vmatpush.bf16.msra.mxu1 %v1806_v25  ;;  %v1893_v16 = vld [vmem:[%s2398_s6 + $0x44] sm:$0xf]  ;;  %v1722_v18 = vor.u32 %v1895_v15, %v1721_v14  ;;  %v1730_v24 = vor.u32 %v1896_v21, %v1729_v20  ;;  %v1894_v25 = vld [vmem:[%s2398_s6 + $0x4c] sm:$0xf] }
  0x7e   : > { %981 = vmatmul.bf16.vlgmr.msrb.gmra.mxu3 %v365_v17  ;;  %1216 = vmatpush.bf16.msra.mxu2 %v1810_v26  ;;  %v1726_v23 = vor.u32 %v1893_v16, %v1723_v19  ;;  %v1731_v26 = vld [vmem:[%s2398_s6 + $0x58] sm:$0xf0] }
  0x7f   : > { %1229 = vmatpush.bf16.msra.mxu3 %v1814_v30  ;;  %v1734_v27 = vor.u32 %v1894_v25, %v1731_v26  ;;  %v1889_v30 = vld [vmem:[%s2398_s6 + $0x24] sm:$0xf] }
  0x80   : > { %1191 = vmatpush.bf16.msra.mxu0 %v1786_v34  ;;  %v1892_v34 = vld [vmem:[%s2398_s6 + $0x34] sm:$0xf0] }
  0x81   : > { %1204 = vmatpush.bf16.msra.mxu1 %v1790_v35  ;;  %v1710_v35 = vor.u32 %v1889_v30, %v1707_v32  ;;  %v1714_v36 = vor.u32 %v1892_v34, %v1713_v33 }
  0x82   : > { %1217 = vmatpush.bf16.msra.mxu2 %v1794_v39 }
  0x83   : > { %1230 = vmatpush.bf16.msra.mxu3 %v1798_v41 }
  0x84   : > { %1192 = vmatpush.bf16.msra.mxu0 %v1770_v45 }
  0x85   : > { %1205 = vmatpush.bf16.msra.mxu1 %v1774_v49  ;;  %v1888_v49 = vld [vmem:[%s2398_s6 + $0x14] sm:$0xf0] }
  0x86   : > { %1218 = vmatpush.bf16.msra.mxu2 %v1778_v50  ;;  %v1698_v52 = vor.u32 %v1888_v49, %v1697_v48 }
  0x87   : > { %1231 = vmatpush.bf16.msra.mxu3 %v1782_v54  ;;  %v1699_v54 = vld [vmem:[%s2398_s6 + $0x18] sm:$0xf0] }
  0x88   : > { %1193 = vmatpush.bf16.msra.mxu0 %v1754_v61  ;;  %v1702_v55 = vor.u32 %v1886_v53, %v1699_v54 }
  0x89   : > { %1206 = vmatpush.bf16.msra.mxu1 %v1758_v63 }
  0x8a   : > { %1219 = vmatpush.bf16.msra.mxu2 %v1762_v0 }
  0x8b   : > { %1232 = vmatpush.bf16.msra.mxu3 %v1766_v1 }
  0x8c   : > { %1194 = vmatpush.bf16.msra.mxu0 %v1738_v5 }
  0x8d   : > { %1207 = vmatpush.bf16.msra.mxu1 %v1742_v9 }
  0x8e   : > { %1220 = vmatpush.bf16.msra.mxu2 %v1746_v10 }
  0x8f   : > { %1233 = vmatpush.bf16.msra.mxu3 %v1750_v13  ;;  %v1020_v13 = vld [vmem:[%s299_s12] sm:$0xf] }
  0x90   : > { %1195 = vmatpush.bf16.msra.mxu0 %v1722_v18  ;;  %v1023_v14 = vperm.slane %v1020_v13, 1  ;;  %v1022_v15 = vperm.slane %v1020_v13, 0  ;;  %v1024_v21 = vperm.slane %v1020_v13, 2 }
  0x91   : > { %1208 = vmatpush.bf16.msra.mxu1 %v1726_v23 }
  0x92   : > { %1221 = vmatpush.bf16.msra.mxu2 %v1730_v24 }
  0x93   : > { %1234 = vmatpush.bf16.msra.mxu3 %v1734_v27 }
  0x94   : > { %1196 = vmatpush.bf16.msra.mxu0 %v1706_v31 }
  0x95   : > { %1209 = vmatpush.bf16.msra.mxu1 %v1710_v35 }
  0x96   : > { %1222 = vmatpush.bf16.msra.mxu2 %v1714_v36 }
  0x97   : > { %1235 = vmatpush.bf16.msra.mxu3 %v1718_v40 }
  0x98   : > { %1197 = vmatpush.bf16.msra.mxu0 %v1690_v46 }
  0x99   : > { %1210 = vmatpush.bf16.msra.mxu1 %v1694_v51 }
  0x9a   : > { %1223 = vmatpush.bf16.msra.mxu2 %v1698_v52 }
  0x9b   : > { %1236 = vmatpush.bf16.msra.mxu3 %v1702_v55 }
  0xd8   : > { %v891_v17 = vpop.f32.mrf.mxu0 }
  0xd9   : > { %v904_v22 = vpop.f32.mrf.mxu1  ;;  %v892_v59 = vadd.f32 %v2011_v56, %v891_v17 }
  0xdb   : > { %v905_v60 = vadd.f32 %v904_v22, %v892_v59  ;;  %v1025_v22 = vperm.slane %v1020_v13, 3 }
  0xe0   : > { %v917_v39 = vpop.f32.mrf.mxu2  ;;  %v893_v45 = vpop.f32.mrf.mxu0 }
  0xe1   : > { %v930_v41 = vpop.f32.mrf.mxu3  ;;  %v906_v50 = vpop.f32.mrf.mxu1  ;;  %v918_v61 = vadd.f32 %v917_v39, %v905_v60 }
  0xe3   : > { %v931_v62 = vadd.f32 %v930_v41, %v918_v61 }
  0xe8   : > { %v919_v57 = vpop.f32.mrf.mxu2 }
  0xe9   : > { %v932_v58 = vpop.f32.mrf.mxu3 }
  0xf8   : > { %v943_v63 = vpop.f32.mrf.mxu0 }
  0xf9   : > { %v956_v0 = vpop.f32.mrf.mxu1  ;;  %v944_v1 = vadd.f32 %v943_v63, %v931_v62 }
  0xfb   : > { %v957_v2 = vadd.f32 %v956_v0, %v944_v1 }
 0x100   : > { %v969_v3 = vpop.f32.mrf.mxu2  ;;  %v945_v6 = vpop.f32.mrf.mxu0 }
 0x101   : > { %v982_v4 = vpop.f32.mrf.mxu3  ;;  %v970_v5 = vadd.f32 %v969_v3, %v957_v2  ;;  %v958_v7 = vpop.f32.mrf.mxu1 }
 0x103   : > { %v983_v8 = vadd.f32 %v982_v4, %v970_v5 }
 0x105   : > { %v986_v9 = vmax.f32 %v983_v8, 0.0 }
 0x107   : > { %v987_v10 = vpack.c.bf16 %v986_v9, %v986_v9 }
 0x108   : > { %v971_v11 = vpop.f32.mrf.mxu2 }
 0x109   : > { %v984_v12 = vpop.f32.mrf.mxu3  ;;  %1198 = vmatmul.bf16.vlgmr.msra.gmra.mxu0 %v987_v10  ;;  %1211 = vmatmul.bf16.vlgmr.msra.gmra.mxu1 %v987_v10 }
 0x10a   : > { %1224 = vmatmul.bf16.vlgmr.msra.gmra.mxu2 %v987_v10  ;;  %1237 = vmatmul.bf16.vlgmr.msra.gmra.mxu3 %v987_v10 }
 0x186   : > { %v1199_v16 = vpop.f32.mrf.mxu0  ;;  %v1212_v17 = vpop.f32.mrf.mxu1 }
 0x187   : > { %v1213_v18 = vadd.f32 %v1212_v17, %v1023_v14  ;;  %v1200_v19 = vadd.f32 %v1199_v16, %v1022_v15 }
 0x189   : > { %v1243_v20 = vmul.f32 0.5, %v1213_v18  ;;  %v1242_v23 = vmul.f32 0.5, %v1200_v19 }
 0x18b   : > { %2012 = vtanh.f32 %v1243_v20 }
 0x18c   : > { %2014 = vtanh.f32 %v1242_v23 }
 0x18d   : > { %v1225_v24 = vpop.f32.mrf.mxu2  ;;  %v1238_v25 = vpop.f32.mrf.mxu3 }
 0x18e   : > { %v1226_v26 = vadd.f32 %v1225_v24, %v1024_v21  ;;  %v1239_v27 = vadd.f32 %v1238_v25, %v1025_v22  ;;  %v1201_v28 = vpop.f32.mrf.mxu0  ;;  %v1214_v29 = vpop.f32.mrf.mxu1 }
 0x190   : > { %v1244_v30 = vmul.f32 0.5, %v1226_v26  ;;  %v1245_v31 = vmul.f32 0.5, %v1239_v27 }
 0x191   : > { %v2013_v32 = vpop.eup %2012 }
 0x192   : > { %2016 = vtanh.f32 %v1244_v30  ;;  %v1251_v33 = vmul.f32 0.5, %v2013_v32  ;;  %v2015_v36 = vpop.eup %2014 }
 0x193   : > { %2018 = vtanh.f32 %v1245_v31  ;;  %v1250_v41 = vmul.f32 0.5, %v2015_v36 }
 0x194   : > { %v1255_v38 = vadd.f32 0.5, %v1251_v33 }
 0x195   : > { %v1227_v34 = vpop.f32.mrf.mxu2  ;;  %v1240_v35 = vpop.f32.mrf.mxu3  ;;  %v1254_v47 = vadd.f32 0.5, %v1250_v41 }
 0x196   : > { %v1262_v44 = vrot.slane %v1255_v38, 6 }
 0x198   : > { %v2017_v37 = vpop.eup %2016  ;;  %v1266_v49 = vsel %vm1265_vm0, %v1254_v47, %v1262_v44 }
 0x199   : > { %v2019_v39 = vpop.eup %2018  ;;  %v1252_v40 = vmul.f32 0.5, %v2017_v37 }
 0x19a   : > { %v1253_v42 = vmul.f32 0.5, %v2019_v39 }
 0x19b   : > { %v1256_v43 = vadd.f32 0.5, %v1252_v40 }
 0x19c   : > { %v1257_v45 = vadd.f32 0.5, %v1253_v42 }
 0x19d   : > { %v1263_v46 = vrot.slane %v1256_v43, 4 }
 0x19e   : > { %v1264_v48 = vrot.slane %v1257_v45, 2 }
 0x1a0   : > { %v1268_v50 = vsel %vm1267_vm1, %v1263_v46, %v1264_v48 }
 0x1a1   : > { %v1270_v51 = vsel %vm1269_vm2, %v1266_v49, %v1268_v50 }
 0x1a2   : > { %1272 = vst [vmem:[%s331_s11] sm:$0xff] %v1270_v51 }
 0x1a3   : > { %2167 = shalt.err (!%p2164_p0)
}
 0x1a4   : > { %1930 = dma.vmem_to_hbm [thread:$0]  (%p2326_p9), %s1290_s14, 128, %s1292_s0, %s1274_s27  }
 0x1a5 PF: > { %s2546_s1 = sld [smem:[#allocation14_spill]]  ;;  %p1947_p2 = pnand %p1419_p1, %p2333_p11 }
 0x1a6   : > { %s2548_s18 = sld [smem:[#allocation16_spill]] }
 0x1a7   : > { %p1948_p3 = pneg %p1947_p2 }
 0x1ab   : > { %s1303_s20 = sand.u32 1, %s2546_s1  }
 0x1ac   : > { %s1304_s6 = scalar_lea.sflag [#allocation4], %s1303_s20 }
 0x1ad   : > { %2205 = dma.done.wait (%p1948_p3), %s1304_s6, 128  }
 0x1ae   : > { %2207 = vsyncadd (%p1948_p3), %s1304_s6, 4294967168  ;;  %s20_s23 = sadd.s32 1, %s2548_s18   ;;  %s2549_s24 = sld [smem:[#allocation15_spill]] }
 0x1af   : > { %p17_p6 = scmp.ge.s32.totalorder %s20_s23, 4   ;;  %s2550_s20 = sld [smem:[#allocation19_spill]] }
 0x1b0   : > { %s2551_s30 = sld [smem:[#allocation17_spill]]  ;;  %s2552_s18 = smov %s2214_s19 }
 0x1b1   : > { %s2554_s21 = smov %s2226_s22 }
 0x1b2   :  { %19 = sbr.rel (!%p17_p6) target bundleno = 10 (0xa), region = 105 }
 0x1b4   : > { %s2553_s19 = smov %s2549_s24 }
 0x1b6   : > { %s2555_s22 = smov %s2551_s30 }
 0x1b7   :  { %1310 = vsyncpa [#allocation3], 1 }
 0x1b8   :  { %1312 = vsyncpa [#allocation3 + $0x1], 1 }
 0x1b9   :  { %1313 = vsyncpa [#allocation6], 1 }
 0x1ba   :  { %1314 = vsyncpa [#allocation4], 1 }
 0x1bb   :  { %1316 = vsyncpa [#allocation4 + $0x1], 1 }

</bundles_post_ra>
